<compile_context>
chip_gen: v7x
topology: tpu7x:2x2x1
jax: 0.10.0
libtpu: 0.0.40
codegen_flags: <defaults>
</compile_context>

<pallas_src>
import jax
import jax.numpy as jnp
from jax import lax
from jax.experimental import pallas as pl
from jax.experimental.pallas import tpu as pltpu


def _vmem_capacity_bytes():
    """Best-effort physical VMEM query; conservative (v7x-sized) fallback."""
    try:
        info = pltpu.get_tpu_info()
        cap = getattr(info, "vmem_capacity_bytes", None)
        if cap:
            return int(cap)
    except Exception:
        pass
    return 64 * 1024 * 1024


def _sublane_multiple(itemsize):
    # Native sublane packing: 8 rows for 4-byte, 16 for 2-byte, 32 for 1-byte.
    return max(8, 32 // max(1, int(itemsize)))


def _pick_block_rows(n, c, itemsize, vmem_cap):
    """Row-tile size: as big as the (generation-aware) VMEM budget allows,
    capped so the grid keeps >= ~8 steps (TensorCore balance on v7x)."""
    sub = _sublane_multiple(itemsize)
    if vmem_cap >= 96 * 1024 * 1024:      # v5e / v6e class (128 MiB VMEM)
        budget = 40 * 1024 * 1024
    else:                                  # v7x class (64 MiB VMEM) / fallback
        budget = 20 * 1024 * 1024
    # Double-buffered logits tiles dominate VMEM use.
    budget_rows = budget // (2 * max(1, c) * itemsize)
    # Grid-balance floor: aim for >= 8 tiles when N is large enough.
    balance_cap = -(-n // 8)                       # cdiv(n, 8)
    balance_cap = ((balance_cap + sub - 1) // sub) * sub
    n_ceil = ((n + sub - 1) // sub) * sub
    rows = min(int(budget_rows), int(balance_cap), int(n_ceil))
    rows = (rows // sub) * sub
    return max(sub, rows)


def _make_ce_kernel(n_rows):
    """Per-tile partial sum of -log p(target) over valid rows.

    logits_ref : (TN, C)   input dtype
    targets_ref: (TN, 1)   int32 (last tile may contain out-of-bounds garbage)
    out_ref    : (1, 8, 128) f32; the tile's partial sum, broadcast lane-dense
    """
    def kernel(logits_ref, targets_ref, out_ref):
        x = logits_ref[...]
        t = targets_ref[...]
        tn, c = x.shape

        # Numerically stable shift by the per-row max.  Stays in the input
        # dtype (bf16 max/sub/exp run natively on v6e/v7x VPU+EUP; on v5e a
        # single upcast here would be preferable for bf16 inputs).
        m = jnp.max(x, axis=-1, keepdims=True)
        shifted = x - m

        # exp in input dtype, row-sum accumulated in f32.
        s = jnp.sum(jnp.exp(shifted).astype(jnp.float32), axis=-1, keepdims=True)

        # One-hot gather of the (shifted) target logit.  Sum in the input
        # dtype (exact: at most one nonzero per row), cast only the column.
        col = lax.broadcasted_iota(jnp.int32, (tn, c), 1)
        sel = jnp.where(col == t, shifted, jnp.zeros_like(shifted))
        tgt_shifted = jnp.sum(sel, axis=-1, keepdims=True).astype(jnp.float32)

        # -log p(target) = logsumexp(x) - x_t = log(s) - (x_t - m)
        # TODO(synk): for bf16 + small C on v7x, pack this (TN,1) column
        # lane-dense before the log to halve EUP pushes; fine as-is otherwise.
        per_example = jnp.log(s) - tgt_shifted

        # Single validity mask: in-bounds row (ragged last tile, n_rows is a
        # trace-time Python int) AND target in [0, C) (PyTorch ignore_index).
        row = pl.program_id(0) * tn + lax.broadcasted_iota(jnp.int32, (tn, 1), 0)
        valid = jnp.logical_and(row < n_rows,
                                jnp.logical_and(t >= 0, t < c))
        per_example = jnp.where(valid, per_example, jnp.zeros_like(per_example))

        # Lane-dense store (avoids masked 1-wide vst path).
        out_ref[...] = jnp.broadcast_to(
            jnp.reshape(jnp.sum(per_example), (1, 1, 1)), out_ref.shape)

    return kernel


def single_loss(outputs, targets, prevGH=None, prevGM=None,
                alpha=None, gamma=None, signal=None, prevRatio=None,
                *, block_rows=None):
    """Equivalent of SingleLoss.forward: mean cross-entropy over `outputs`."""
    del prevGH, prevGM, alpha, gamma, signal, prevRatio  # unused, as in reference
    n, c = outputs.shape
    itemsize = jnp.dtype(outputs.dtype).itemsize
    sub = _sublane_multiple(itemsize)
    vmem_cap = _vmem_capacity_bytes()

    if block_rows is None:
        tn = _pick_block_rows(n, c, itemsize, vmem_cap)
    else:
        tn = max(sub, (int(block_rows) // sub) * sub)
    num_tiles = -(-n // tn)                         # cdiv; last tile may be ragged

    targets_2d = targets.astype(jnp.int32).reshape(n, 1)

    vmem_limit = (80 * 1024 * 1024 if vmem_cap >= 96 * 1024 * 1024
                  else 32 * 1024 * 1024)

    # TODO(synk): for very large class counts (e.g. 128K+ vocab) add a second
    # grid axis over C with an online-logsumexp accumulator; not needed here.
    partials = pl.pallas_call(
        _make_ce_kernel(n),
        out_shape=jax.ShapeDtypeStruct((num_tiles, 8, 128), jnp.float32),
        grid=(num_tiles,),
        in_specs=[
            pl.BlockSpec((tn, c), lambda i: (i, 0)),
            pl.BlockSpec((tn, 1), lambda i: (i, 0)),
        ],
        out_specs=pl.BlockSpec((1, 8, 128), lambda i: (i, 0, 0)),
        compiler_params=pltpu.CompilerParams(
            dimension_semantics=("parallel",),
            vmem_limit_bytes=vmem_limit,
        ),
    )(outputs, targets_2d)

    # Final mean in plain JAX (PyTorch ignore_index semantics: ignored
    # targets excluded from the denominator).
    t32 = targets.astype(jnp.int32)
    n_valid = jnp.sum(jnp.logical_and(t32 >= 0, t32 < c))
    inv = 1.0 / jnp.maximum(n_valid, 1).astype(jnp.float32)
    return jnp.sum(partials[:, 0, 0]) * inv


if __name__ == "__main__":
    key = jax.random.PRNGKey(0)
    k_logits, k_targets = jax.random.split(key)

    # Small but non-trivial: N not a multiple of the tile (exercises the
    # in-kernel ragged-row mask, no logits padding), C lane-aligned.
    N, C = 250, 128
    outputs = jax.random.normal(k_logits, (N, C), dtype=jnp.float32)
    targets = jax.random.randint(k_targets, (N,), 0, C, dtype=jnp.int32)
    targets = targets.at[7].set(-100)   # exercise PyTorch's default ignore_index

    # Dummy extra args (ignored by the module's forward)
    prevGH = jnp.zeros((1,), jnp.float32)
    prevGM = jnp.zeros((1,), jnp.float32)

    loss = single_loss(outputs, targets, prevGH, prevGM, 0.5, 2.0, 1, 0.1)
    jax.block_until_ready(loss)

    # Reference: plain-JAX cross-entropy with ignore_index=-100 semantics.
    valid = jnp.logical_and(targets >= 0, targets < C)
    lse = jax.scipy.special.logsumexp(outputs, axis=-1)
    x_t = outputs[jnp.arange(N), jnp.clip(targets, 0, C - 1)]
    per = jnp.where(valid, lse - x_t, 0.0)
    ref = jnp.sum(per) / jnp.maximum(jnp.sum(valid), 1).astype(jnp.float32)

    assert jnp.allclose(loss, ref, atol=1e-4, rtol=1e-5), (loss, ref)
    print("KERNEL_OK")
</pallas_src>

<mosaic_0001>
module attributes {stable_mosaic.version = 11 : i64} {
  func.func @kernel(%arg0: i32, %arg1: memref<32x128xf32, #tpu.memory_space<vmem>>, %arg2: memref<32x1xi32, #tpu.memory_space<vmem>>, %arg3: memref<1x8x128xf32, #tpu.memory_space<vmem>>) attributes {dimension_semantics = [#tpu.dimension_semantics<parallel>], iteration_bounds = array<i64: 8>, scalar_prefetch = 0 : i64, scratch_operands = 0 : i64, tpu.core_type = #tpu.core_type<tc>, window_params = [{transform_indices = @transform_0, window_bounds = array<i64: 32, 128>}, {transform_indices = @transform_1, window_bounds = array<i64: 32, 1>}, {transform_indices = @transform_2, window_bounds = array<i64: 1, 8, 128>}]} {
    %c0 = arith.constant 0 : index
    %c0_0 = arith.constant 0 : index
    %0 = vector.load %arg1[%c0, %c0_0] : memref<32x128xf32, #tpu.memory_space<vmem>>, vector<32x128xf32>
    %c0_1 = arith.constant 0 : index
    %c0_2 = arith.constant 0 : index
    %1 = vector.load %arg2[%c0_1, %c0_2] : memref<32x1xi32, #tpu.memory_space<vmem>>, vector<32x1xi32>
    %cst = arith.constant dense<0xFF800000> : vector<32xf32>
    %2 = vector.multi_reduction <maximumf>, %0, %cst [1] : vector<32x128xf32> to vector<32xf32>
    %3 = vector.shape_cast %2 : vector<32xf32> to vector<32x1xf32>
    %4 = vector.broadcast %3 : vector<32x1xf32> to vector<32x128xf32>
    %5 = arith.subf %0, %4 : vector<32x128xf32>
    %6 = math.exp %5 : vector<32x128xf32>
    %cst_3 = arith.constant dense<0.000000e+00> : vector<32xf32>
    %7 = vector.multi_reduction <add>, %6, %cst_3 [1] : vector<32x128xf32> to vector<32xf32>
    %8 = vector.shape_cast %7 : vector<32xf32> to vector<32x1xf32>
    %9 = tpu.iota {dimensions = array<i32: 1>} : vector<32x128xi32>
    %10 = vector.broadcast %1 : vector<32x1xi32> to vector<32x128xi32>
    %11 = arith.cmpi eq, %9, %10 : vector<32x128xi32>
    %cst_4 = arith.constant 0.000000e+00 : f32
    %12 = vector.broadcast %cst_4 : f32 to vector<32x128xf32>
    %13 = arith.select %11, %5, %12 : vector<32x128xi1>, vector<32x128xf32>
    %cst_5 = arith.constant dense<0.000000e+00> : vector<32xf32>
    %14 = vector.multi_reduction <add>, %13, %cst_5 [1] : vector<32x128xf32> to vector<32xf32>
    %15 = vector.shape_cast %14 : vector<32xf32> to vector<32x1xf32>
    %16 = math.log %8 : vector<32x1xf32>
    %17 = arith.subf %16, %15 : vector<32x1xf32>
    %c32_i32 = arith.constant 32 : i32
    %18 = arith.muli %arg0, %c32_i32 : i32
    %19 = tpu.iota {dimensions = array<i32: 0>} : vector<32x1xi32>
    %20 = vector.broadcast %18 : i32 to vector<32x1xi32>
    %21 = arith.addi %20, %19 : vector<32x1xi32>
    %c250_i32 = arith.constant 250 : i32
    %22 = vector.broadcast %c250_i32 : i32 to vector<32x1xi32>
    %23 = arith.cmpi slt, %21, %22 : vector<32x1xi32>
    %c0_i32 = arith.constant 0 : i32
    %24 = vector.broadcast %c0_i32 : i32 to vector<32x1xi32>
    %25 = arith.cmpi sge, %1, %24 : vector<32x1xi32>
    %c128_i32 = arith.constant 128 : i32
    %26 = vector.broadcast %c128_i32 : i32 to vector<32x1xi32>
    %27 = arith.cmpi slt, %1, %26 : vector<32x1xi32>
    %28 = arith.andi %25, %27 : vector<32x1xi1>
    %29 = arith.andi %23, %28 : vector<32x1xi1>
    %cst_6 = arith.constant 0.000000e+00 : f32
    %30 = vector.broadcast %cst_6 : f32 to vector<32x1xf32>
    %31 = arith.select %29, %17, %30 : vector<32x1xi1>, vector<32x1xf32>
    %32 = vector.shape_cast %31 : vector<32x1xf32> to vector<1x32x1xf32>
    %cst_7 = arith.constant dense<0.000000e+00> : vector<1xf32>
    %33 = vector.multi_reduction <add>, %32, %cst_7 [1, 2] : vector<1x32x1xf32> to vector<1xf32>
    %34 = vector.shape_cast %33 : vector<1xf32> to vector<1x1x1xf32>
    %35 = vector.extract %34[0, 0, 0] : f32 from vector<1x1x1xf32>
    %36 = vector.broadcast %35 : f32 to vector<1x1x1xf32>
    %37 = vector.shape_cast %36 : vector<1x1x1xf32> to vector<1x1x1xf32>
    %38 = vector.broadcast %37 : vector<1x1x1xf32> to vector<1x8x128xf32>
    %c0_8 = arith.constant 0 : index
    %c0_9 = arith.constant 0 : index
    %c0_10 = arith.constant 0 : index
    %39 = vector.load %arg3[%c0_8, %c0_9, %c0_10] : memref<1x8x128xf32, #tpu.memory_space<vmem>>, vector<1x8x128xf32>
    tpu.vector_store %arg3[%c0_8, %c0_9, %c0_10], %38 {strides = array<i32>} : memref<1x8x128xf32, #tpu.memory_space<vmem>>, vector<1x8x128xf32>,
    return
  }
  func.func @transform_0(%arg0: i32) -> (i32, i32) {
    %c0_i32 = arith.constant 0 : i32
    %c0_i32_0 = arith.constant 0 : i32
    return %arg0, %c0_i32 : i32, i32
  }
  func.func @transform_1(%arg0: i32) -> (i32, i32) {
    %c0_i32 = arith.constant 0 : i32
    %c0_i32_0 = arith.constant 0 : i32
    return %arg0, %c0_i32 : i32, i32
  }
  func.func @transform_2(%arg0: i32) -> (i32, i32, i32) {
    %c0_i32 = arith.constant 0 : i32
    %c0_i32_0 = arith.constant 0 : i32
    %c0_i32_1 = arith.constant 0 : i32
    return %arg0, %c0_i32, %c0_i32_0 : i32, i32, i32
  }
}

</mosaic_0001>

<bundles_post_ra>
// kernel: tpu_custom_call.1
= control target key start
LH: loop header
LB: loop body
LE: loop exit
PB: predicated region body
PF: predicated region fallthrough
CT: control target
= control target key end

     0   :  { %7 = vsyncpa [#allocation3], 0  ;;  %s675_s0 = inlined_call_operand.vmem [shape: f32[250,128], index: 0, kind: input, shape index: {}]   ;;  %s676_s1 = inlined_call_operand.vmem [shape: s32[250,1], index: 1, kind: input, shape index: {}]   ;;  %s677_s2 = inlined_call_operand.hbm [shape: f32[8,8,128], index: 2, kind: output, shape index: {}]  }
   0x1   :  { %9 = vsyncpa [#allocation3 + $0x1], 0  ;;  %s538_s9 = smov 0   ;;  %s540_s10 = smov 0  }
   0x2   :  { %s542_s11 = smov 0   ;;  %s544_s12 = smov 0  }
   0x3 LB: > { %s559_s13 = sadd.s32 4294967295, %s519_s12   ;;  %s383_s14 = sadd.s32 4294967294, %s519_s12   ;;  %s519_s12 = sphi %s544_s12, %s691_s12   ;;  %s515_s11 = sphi %s542_s11, %s690_s11   ;;  %s511_s10 = sphi %s540_s10, %s689_s10   ;;  %s507_s9 = sphi %s538_s9, %s688_s9  }
   0x4   : > { %s563_s15 = sadd.s32 1, %s519_s12   ;;  %s74_s16 = sadd.s32 1, %s515_s11 }
   0x5   : > { %s71_s17 = ssub.s32 %s519_s12, %s563_s15  ;;  %p84_p0 = scmp.ne.s32.totalorder %s515_s11, %s511_s10 }
   0x6   : > { %p72_p1 = scmp.eq.s32.totalorder %s71_s17, 0  ;;  %p85_p2 = scmp.eq.s32.totalorder %s559_s13, 7 }
   0x7   : > { %p90_p3 = scmp.ne.s32.totalorder %s511_s10, %s507_s9  ;;  %p91_p4 = scmp.eq.s32.totalorder %s383_s14, 7 }
   0x8   : > { %s574_s18 = scalar_select %p72_p1, %s515_s11, %s74_s16  }
   0x9   : > { %p576_p5 = por %p85_p2, %p84_p0  ;;  %p580_p6 = por %p91_p4, %p90_p3 }
   0xa   : > { %p386_p7 = scmp.ge.s32.totalorder %s519_s12, 1  ;;  %p127_p8 = scmp.lt.s32.totalorder %s519_s12, 9 }
   0xc   : > { %p128_p9 = pnand %p386_p7, %p127_p8 }
   0xd   : > { %s388_s21 = sshll.u32 (!%p128_p9), %s559_s13, 2  ;;  %v521_v0 = vmov (!%p128_p9), 0   ;;  %v202_v22 = vlaneseq (!%p128_p9)  ;;  %s392_s29 = sshll.u32 (!%p128_p9), %s559_s13, 5 }
   0xe   : > { %131 = sbr.rel (%p128_p9) target bundleno = 571 (0x23b), region = 28  ;;  %p155_p10 = scmp.lt.s32.totalorder (!%p128_p9), %s388_s21, 31  ;;  %440 = vset.pattern.permute.xlu1 (!%p128_p9), %v521_v0  ;;  %439 = vset.pattern.permute.xlu0 (!%p128_p9), %v521_v0  ;;  %v250_v36 = vstv (!%p128_p9), %s392_s29 }
   0xf   : > { %v203_v26 = vand.u32 (!%p128_p9), 127, %v202_v22  ;;  %v246_v35 = vshrl.u32 (!%p128_p9), %v202_v22, 7  ;;  %s151_s30 = sand.u32 (!%p128_p9), 1, %s511_s10   ;;  %s394_s6 = sshll.u32 (!%p128_p9), %s559_s13, 7 }
  0x10   : > { %s387_s3 = sshll.u32 (!%p128_p9), %s151_s30, 3  ;;  %s635_s16 = scalar_lea.hbm (!%p128_p9), %s677_s2, %s394_s6 }
  0x11   : > { %v251_v37 = vadd.s32 (!%p128_p9), %v250_v36, %v246_v35  ;;  %v248_v38 = vadd.s32 (!%p128_p9), 16, %v246_v35  ;;  %v247_v39 = vadd.s32 (!%p128_p9), 8, %v246_v35  ;;  %v249_v43 = vadd.s32 (!%p128_p9), 24, %v246_v35  ;;  %s153_s4 = scalar_lea.vmem (!%p128_p9), [#allocation2], %s387_s3  ;;  %s299_s17 = scalar_lea.sflag (!%p128_p9), [#allocation3], %s151_s30 }
  0x12   : > { %s312_s5 = sshll.u32 (!%p128_p9), %s153_s4, 4  ;;  %s522_s13 = smov (!%p128_p9), [#allocation2]   ;;  %s630_s5 = int_to_ptr.vmem [resolvable:$true] %s312_s5 }
  0x13   : > { %vm255_vm8 = vcmp.lt.s32.totalorder (!%p128_p9), %v251_v37, 250  ;;  %v253_v40 = vadd.s32 (!%p128_p9), %v250_v36, %v248_v38  ;;  %v252_v42 = vadd.s32 (!%p128_p9), %v250_v36, %v247_v39  ;;  %v254_v46 = vadd.s32 (!%p128_p9), %v250_v36, %v249_v43 }
  0x15   : > { %s693_s21 = smov (!%p155_p10, %s388_s21), 31  ;;  %vm257_vm14 = vcmp.lt.s32.totalorder %v253_v40, 250  ;;  %vm256_vm15 = vcmp.lt.s32.totalorder %v252_v42, 250 }
  0x16   : > { %s389_s22 = sshll.u32 %s693_s21, 3  ;;  %s457_s21 = scalar_lea.vmem %s630_s5, 128 }
  0x17   : > { %s158_s25 = scalar_lea.vmem %s675_s0, %s389_s22  ;;  %s164_s28 = scalar_lea.vmem %s676_s1, %s389_s22 }
  0x18   : > { %v168_v1 = vld [vmem:[%s158_s25 + $0x10] sm:$0xff]  ;;  %v166_v2 = vld [vmem:[%s158_s25] sm:$0xff]  ;;  %v169_v3 = vld [vmem:[%s158_s25 + $0x18] sm:$0xff]  ;;  %p458_p11 = scmp.ne.s32.totalorder %s630_s5, %s457_s21  ;;  %s461_s22 = sshll.u32 %s522_s13, 4  ;;  %s462_s22 = int_to_ptr.vmem [resolvable:$false] %s461_s22 }
  0x19   : > { %178 = vmax.xlane.f32.xlu1 %v168_v1  ;;  %174 = vmax.xlane.f32.xlu0 %v166_v2  ;;  %v167_v4 = vld [vmem:[%s158_s25 + $0x8] sm:$0xff]  ;;  %v172_v6 = vld [vmem:[%s164_s28 + $0x10] sm:$0xff]  ;;  %v170_v7 = vld [vmem:[%s164_s28] sm:$0xff]  ;;  %s463_s23 = scalar_lea.vmem %s462_s22, 256  ;;  %p464_p0 = scmp.lt.s32.totalorder %s630_s5, %s462_s22 }
  0x1a   : > { %v593_v5 = vld [vmem:[%s164_s28 + $0x8] sm:$0xff]  ;;  %v596_v8 = vld [vmem:[%s164_s28 + $0x18] sm:$0xff]  ;;  %vm259_vm4 = vcmp.ge.s32.totalorder %v170_v7, 0  ;;  %vm263_vm5 = vcmp.lt.s32.totalorder %v170_v7, 128  ;;  %vm261_vm6 = vcmp.ge.s32.totalorder %v172_v6, 0  ;;  %vm265_vm7 = vcmp.lt.s32.totalorder %v172_v6, 128  ;;  %p459_p12 = pnand %p458_p11, %p576_p5  ;;  %p465_p1 = scmp.lt.s32.totalorder %s463_s23, %s457_s21 }
  0x1b   : > { %vm267_vm9 = vmand %vm259_vm4, %vm263_vm5  ;;  %vm260_vm10 = vcmp.ge.s32.totalorder %v593_v5, 0  ;;  %vm264_vm11 = vcmp.lt.s32.totalorder %v593_v5, 128  ;;  %vm258_vm5 = vcmp.lt.s32.totalorder %v254_v46, 250 }
  0x1c   : > { %vm269_vm12 = vmand %vm261_vm6, %vm265_vm7  ;;  %p460_p13 = pneg %p459_p12  ;;  %p466_p2 = por %p465_p1, %p464_p0 }
  0x1d   : > { %180 = vmax.xlane.f32.xlu1 %v169_v3  ;;  %176 = vmax.xlane.f32.xlu0 %v167_v4  ;;  %vm602_vm13 = vmand %vm255_vm8, %vm267_vm9  ;;  %vm279_vm8 = vcmask 7168  }
  0x1e   : > { %p467_p3 = pnand %p466_p2, %p460_p13 }
  0x2e   : > { %208 = vperm.xlu1 %440, %v593_v5  }
  0x32   : > { %211 = vperm.xlu1 %440, %v172_v6  }
  0x33   : > { %205 = vperm.xlu0 %439, %v170_v7  }
  0x36   : > { %214 = vperm.xlu1 %440, %v596_v8  }
  0xa6   : > { %v179_v9 = vpop.xlane.xlu1 %178  ;;  %v175_v10 = vpop.xlane.xlu0 %174 }
  0xa7   : > { %v184_v11 = vsub.f32 %v168_v1, %v179_v9  ;;  %v182_v12 = vsub.f32 %v166_v2, %v175_v10 }
  0xa9   : > { %v186_v13 = vmul.f32 1.442695, %v182_v12  ;;  %v190_v14 = vmul.f32 1.442695, %v184_v11 }
  0xaa   : > { %v181_v15 = vpop.xlane.xlu1 %180  ;;  %v177_v16 = vpop.xlane.xlu0 %176 }
  0xab   : > { %v185_v17 = vsub.f32 %v169_v3, %v181_v15  ;;  %v183_v18 = vsub.f32 %v167_v4, %v177_v16  ;;  %441 = vpow2.f32 %v186_v13 }
  0xac   : > { %443 = vpow2.f32 %v190_v14 }
  0xad   : > { %v188_v19 = vmul.f32 1.442695, %v183_v18  ;;  %v192_v20 = vmul.f32 1.442695, %v185_v17 }
  0xae   : > { %v209_v21 = vpop.permute.xlu1 %208 }
  0xaf   : > { %445 = vpow2.f32 %v188_v19  ;;  %vm217_vm2 = vcmp.eq.s32.totalorder %v203_v26, %v209_v21 }
  0xb0   : > { %447 = vpow2.f32 %v192_v20  ;;  %v221_v33 = vsel %vm217_vm2, %v183_v18, 0.0  ;;  %vm266_vm2 = vcmp.lt.s32.totalorder %v596_v8, 128 }
  0xb2   : > { %v212_v25 = vpop.permute.xlu1 %211  ;;  %v206_v29 = vpop.permute.xlu0 %205 }
  0xb3   : > { %vm218_vm0 = vcmp.eq.s32.totalorder %v203_v26, %v212_v25  ;;  %vm216_vm1 = vcmp.eq.s32.totalorder %v203_v26, %v206_v29 }
  0xb4   : > { %v222_v30 = vsel %vm218_vm0, %v184_v11, 0.0  ;;  %v220_v31 = vsel %vm216_vm1, %v182_v12, 0.0  ;;  %vm268_vm0 = vmand %vm260_vm10, %vm264_vm11  ;;  %vm262_vm1 = vcmp.ge.s32.totalorder %v596_v8, 0 }
  0xb5   : > { %v442_v23 = vpop.eup %441  ;;  %vm612_vm4 = vmand %vm256_vm15, %vm268_vm0 }
  0xb6   : > { %194 = vadd.xlane.f32.xlu1 %v442_v23  ;;  %v444_v24 = vpop.eup %443  ;;  %v215_v32 = vpop.permute.xlu1 %214  ;;  %vm270_vm6 = vmand %vm262_vm1, %vm266_vm2 }
  0xb7   : > { %vm219_vm3 = vcmp.eq.s32.totalorder %v203_v26, %v215_v32  ;;  %vm616_vm7 = vmand %vm258_vm5, %vm270_vm6 }
  0xb8   : > { %v223_v34 = vsel %vm219_vm3, %v185_v17, 0.0  ;;  %vm608_vm3 = vmand %vm257_vm14, %vm269_vm12 }
  0xb9   : > { %v446_v27 = vpop.eup %445 }
  0xba   : > { %198 = vadd.xlane.f32.xlu1 %v444_v24  ;;  %196 = vadd.xlane.f32.xlu0 %v446_v27  ;;  %v448_v28 = vpop.eup %447 }
  0xbe   : > { %200 = vadd.xlane.f32.xlu1 %v448_v28  ;;  %228 = vadd.xlane.f32.xlu0 %v222_v30 }
  0xc2   : > { %224 = vadd.xlane.f32.xlu1 %v220_v31 }
  0xc6   : > { %226 = vadd.xlane.f32.xlu1 %v221_v33 }
  0xca   : > { %230 = vadd.xlane.f32.xlu1 %v223_v34 }
 0x143   : > { %v195_v48 = vpop.xlane.xlu1 %194 }
 0x144   : > { %449 = vlog2.f32 %v195_v48 }
 0x147   : > { %v199_v49 = vpop.xlane.xlu1 %198  ;;  %v197_v50 = vpop.xlane.xlu0 %196 }
 0x148   : > { %451 = vlog2.f32 %v199_v49 }
 0x149   : > { %453 = vlog2.f32 %v197_v50 }
 0x14b   : > { %v201_v51 = vpop.xlane.xlu1 %200  ;;  %v229_v60 = vpop.xlane.xlu0 %228 }
 0x14c   : > { %455 = vlog2.f32 %v201_v51 }
 0x14e   : > { %v450_v52 = vpop.eup %449 }
 0x14f   : > { %v233_v53 = vmul.f32 0.6931472, %v450_v52  ;;  %v225_v54 = vpop.xlane.xlu1 %224 }
 0x151   : > { %v240_v56 = vsub.f32 %v233_v53, %v225_v54 }
 0x152   : > { %v452_v55 = vpop.eup %451 }
 0x153   : > { %v454_v57 = vpop.eup %453  ;;  %v237_v58 = vmul.f32 0.6931472, %v452_v55  ;;  %v227_v59 = vpop.xlane.xlu1 %226  ;;  %v275_v0 = vsel %vm602_vm13, %v240_v56, 0.0 }
 0x154   : > { %v235_v61 = vmul.f32 0.6931472, %v454_v57  ;;  %v280_v6 = vsel %vm279_vm8, %v275_v0, 0.0 }
 0x155   : > { %v242_v62 = vsub.f32 %v237_v58, %v229_v60 }
 0x156   : > { %v456_v63 = vpop.eup %455  ;;  %v241_v1 = vsub.f32 %v235_v61, %v227_v59 }
 0x157   : > { %v239_v2 = vmul.f32 0.6931472, %v456_v63  ;;  %v231_v3 = vpop.xlane.xlu1 %230  ;;  %v277_v4 = vsel %vm608_vm3, %v242_v62, 0.0 }
 0x158   : > { %v276_v5 = vsel %vm612_vm4, %v241_v1, 0.0  ;;  %v283_v10 = vsel %vm279_vm8, %v277_v4, 0.0 }
 0x159   : > { %v281_v7 = vsel %vm279_vm8, %v276_v5, 0.0  ;;  %v243_v8 = vsub.f32 %v239_v2, %v231_v3 }
 0x15a   : > { %v282_v9 = vadd.f32 %v281_v7, %v280_v6 }
 0x15b   : > { %v278_v11 = vsel %vm616_vm7, %v243_v8, 0.0 }
 0x15c   : > { %v284_v12 = vadd.f32 %v283_v10, %v282_v9  ;;  %v285_v13 = vsel %vm279_vm8, %v278_v11, 0.0 }
 0x15e   : > { %v286_v14 = vadd.f32 %v285_v13, %v284_v12 }
 0x160   : > { %287 = vadd.xlane.f32.xlu0 %v286_v14 }
 0x1ed   : > { %v288_v15 = vpop.xlane.xlu0 %287 }
 0x1ee   : > { %v289_v16 = vrot.slane %v288_v15, 4 }
 0x1f0   : > { %v290_v17 = vadd.f32 %v289_v16, %v288_v15 }
 0x1f2   : > { %v291_v18 = vrot.slane %v290_v17, 2 }
 0x1f4   : > { %v292_v19 = vadd.f32 %v291_v18, %v290_v17 }
 0x1f6   : > { %v293_v20 = vrot.slane %v292_v19, 1 }
 0x1f8   : > { %v294_v21 = vadd.f32 %v293_v20, %v292_v19 }
 0x1fa   : > { %397 = vpush %v294_v21 }
 0x22b   : > { %s398_s7 = spop %397 }
 0x22c   : > { %v296_v22 = vstv %s398_s7 }
 0x22d   : > { %297 = vst [vmem:[%s153_s4] sm:$0xff] %v296_v22 }
 0x22e   : > { %470 = shalt.err (!%p467_p3)
}
 0x22f   : > { %s471_s24 = scalar_lea.hbm %s635_s16, 128  ;;  %s475_s27 = scalar_lea.hbm %s677_s2, 1024 }
 0x230   : > { %p472_p4 = scmp.ne.s32.totalorder %s635_s16, %s471_s24  ;;  %p476_p9 = scmp.lt.u32.totalorder %s635_s16, %s677_s2 }
 0x231   : > { %p477_p10 = scmp.lt.u32.totalorder %s475_s27, %s471_s24  ;;  %p479_p12 = scmp.lt.u32.totalorder %s471_s24, %s635_s16 }
 0x232   : > { %p473_p7 = pnand %p472_p4, %p576_p5 }
 0x233   : > { %p478_p11 = por %p477_p10, %p476_p9 }
 0x234   : > { %p474_p8 = pneg %p473_p7 }
 0x235   : > { %p480_p13 = por %p479_p12, %p478_p11 }
 0x237   : > { %p481_p0 = pnand %p480_p13, %p474_p8 }
 0x239   : > { %484 = shalt.err (!%p481_p0)
}
 0x23a   : > { %399 = dma.vmem_to_hbm [thread:$0]  (%p576_p5), %s630_s5, 128, %s635_s16, %s299_s17  }
 0x23b PF: > { %p405_p1 = scmp.ge.s32.totalorder %s519_s12, 2  ;;  %s324_s30 = sand.u32 1, %s507_s9  }
 0x23c   : > { %s325_s3 = scalar_lea.sflag [#allocation3], %s324_s30 }
 0x23d   : > { %p402_p2 = pnand %p405_p1, %p580_p6 }
 0x23f   : > { %502 = dma.done.wait (!%p402_p2), %s325_s3, 128  }
 0x240   : > { %504 = vsyncadd (!%p402_p2), %s325_s3, 4294967168  ;;  %p12_p3 = scmp.ge.s32.totalorder %s563_s15, 10   ;;  %s688_s9 = smov %s511_s10 }
 0x241   : > { %s689_s10 = smov %s515_s11  ;;  %s690_s11 = smov %s574_s18 }
 0x242   : > { %s691_s12 = smov %s563_s15  ;;  %14 = sbr.rel (!%p12_p3) target bundleno = 3 (0x3), region = 66 }
 0x249   :  { %330 = vsyncpa [#allocation3], 1 }
 0x24a   :  { %332 = vsyncpa [#allocation3 + $0x1], 1 }

</bundles_post_ra>
